<compile_context>
chip_gen: v7x
topology: tpu7x:2x2x1
jax: 0.10.0
libtpu: 0.0.40
codegen_flags: <defaults>
</compile_context>

<pallas_src>
import jax
import jax.numpy as jnp
from jax.experimental import pallas as pl
from jax.experimental.pallas import tpu as pltpu


def _abs_tanh_kernel(x_ref, o_ref):
    # tanh -> EUP, abs -> VPU; both elementwise on the VMEM tile.
    o_ref[...] = jnp.abs(jnp.tanh(x_ref[...]))


_LANE_CANDIDATES = (1024, 512, 256, 128)   # prefer wide, lane-dense rows
_SUBLANE_ALIGN = 32                        # safe alignment for f32/bf16/int8
_TARGET_BLOCK_BYTES = 2 << 20              # ~2 MiB/block -> ~8 MiB pipelined VMEM


def _choose_tiling(n_elems: int, itemsize: int):
    """Pick (lanes, rows, tile_rows) for a copy-free 2-D view, or None."""
    lanes = None
    for cand in _LANE_CANDIDATES:
        if n_elems % cand == 0:
            lanes = cand
            break
    if lanes is None:
        return None
    rows = n_elems // lanes

    tile_rows = _TARGET_BLOCK_BYTES // (lanes * itemsize)
    tile_rows = max(_SUBLANE_ALIGN, (tile_rows // _SUBLANE_ALIGN) * _SUBLANE_ALIGN)

    if tile_rows >= rows:
        if rows >= 2 * _SUBLANE_ALIGN:
            # Small-ish input: split into 2 blocks so both v7x TensorCores work.
            half = -(-rows // 2)
            tile_rows = -(-half // _SUBLANE_ALIGN) * _SUBLANE_ALIGN
        else:
            # Tiny input: one block covering everything (block == full dims is legal).
            tile_rows = rows
    return lanes, rows, tile_rows


def _abs_tanh_2d(x2d: jax.Array, tile_rows: int) -> jax.Array:
    rows, lanes = x2d.shape
    grid = (pl.cdiv(rows, tile_rows),)
    return pl.pallas_call(
        _abs_tanh_kernel,
        out_shape=jax.ShapeDtypeStruct((rows, lanes), x2d.dtype),
        grid=grid,
        in_specs=[pl.BlockSpec((tile_rows, lanes), lambda i: (i, 0))],
        out_specs=pl.BlockSpec((tile_rows, lanes), lambda i: (i, 0)),
        compiler_params=pltpu.CompilerParams(
            dimension_semantics=("parallel",),
            # ~8 MiB actually used; raised limit keeps headroom on v5e's
            # 16 MiB scoped default without exceeding v7x's 64 MiB physical.
            vmem_limit_bytes=32 << 20,
        ),
    )(x2d)


def abs_tanh(x: jax.Array) -> jax.Array:
    """Computes abs(tanh(x)) elementwise via a Pallas TPU kernel."""
    orig_shape = x.shape
    n = x.size
    if n == 0:
        return x

    tiling = _choose_tiling(n, jnp.dtype(x.dtype).itemsize)
    if tiling is None:
        # Rare fallback: total size not a multiple of 128 lanes.  Pad by
        # < 128 elements (one small copy) and recurse on the padded buffer.
        # TODO(synk): mask the ragged lane tail inside the kernel instead to
        # make even this path copy-free.
        pad = (-n) % 128
        x_flat = jnp.concatenate([x.reshape(-1), jnp.zeros((pad,), x.dtype)])
        y_flat = abs_tanh(x_flat)
        return y_flat[:n].reshape(orig_shape)

    lanes, rows, tile_rows = tiling
    x2d = x.reshape(rows, lanes)          # contiguous reshape: no HBM copy
    y2d = _abs_tanh_2d(x2d, tile_rows)
    return y2d.reshape(orig_shape)        # contiguous reshape: no HBM copy


if __name__ == "__main__":
    key = jax.random.PRNGKey(0)

    # Small NCHW-style activation tensor consistent with the module's usage.
    x = jax.random.normal(key, (2, 4, 16, 16), dtype=jnp.float32) * 3.0
    y = jax.block_until_ready(abs_tanh(x))
    y_ref = jnp.abs(jnp.tanh(x))
    assert y.shape == x.shape and y.dtype == x.dtype
    assert jnp.max(jnp.abs(y - y_ref)) < 1e-6

    # Exercise the non-128-divisible fallback path as well.
    x_odd = jax.random.normal(jax.random.PRNGKey(1), (2, 3, 50), dtype=jnp.float32)
    y_odd = jax.block_until_ready(abs_tanh(x_odd))
    assert y_odd.shape == x_odd.shape
    assert jnp.max(jnp.abs(y_odd - jnp.abs(jnp.tanh(x_odd)))) < 1e-6

    print("KERNEL_OK")
</pallas_src>

<mosaic_0001>
module attributes {stable_mosaic.version = 11 : i64} {
  func.func @_abs_tanh_kernel(%arg0: i32, %arg1: memref<2x1024xf32, #tpu.memory_space<vmem>>, %arg2: memref<2x1024xf32, #tpu.memory_space<vmem>>) attributes {dimension_semantics = [#tpu.dimension_semantics<parallel>], iteration_bounds = array<i64: 1>, scalar_prefetch = 0 : i64, scratch_operands = 0 : i64, tpu.core_type = #tpu.core_type<tc>, window_params = [{transform_indices = @transform_0, window_bounds = array<i64: 2, 1024>}, {transform_indices = @transform_1, window_bounds = array<i64: 2, 1024>}]} {
    %c0 = arith.constant 0 : index
    %c0_0 = arith.constant 0 : index
    %0 = vector.load %arg1[%c0, %c0_0] : memref<2x1024xf32, #tpu.memory_space<vmem>>, vector<2x1024xf32>
    %1 = math.tanh %0 : vector<2x1024xf32>
    %2 = math.absf %1 : vector<2x1024xf32>
    %c0_1 = arith.constant 0 : index
    %c0_2 = arith.constant 0 : index
    %3 = vector.load %arg2[%c0_1, %c0_2] : memref<2x1024xf32, #tpu.memory_space<vmem>>, vector<2x1024xf32>
    tpu.vector_store %arg2[%c0_1, %c0_2], %2 {strides = array<i32>} : memref<2x1024xf32, #tpu.memory_space<vmem>>, vector<2x1024xf32>,
    return
  }
  func.func @transform_0(%arg0: i32) -> (i32, i32) {
    %c0_i32 = arith.constant 0 : i32
    %c0_i32_0 = arith.constant 0 : i32
    return %arg0, %c0_i32 : i32, i32
  }
  func.func @transform_1(%arg0: i32) -> (i32, i32) {
    %c0_i32 = arith.constant 0 : i32
    %c0_i32_0 = arith.constant 0 : i32
    return %arg0, %c0_i32 : i32, i32
  }
}

</mosaic_0001>

<bundles_post_ra>
// kernel: tpu_custom_call.1
= control target key start
LH: loop header
LB: loop body
LE: loop exit
PB: predicated region body
PF: predicated region fallthrough
CT: control target
= control target key end

     0   :  { %6 = vsyncpa [#allocation3], 0  ;;  %s134_s0 = inlined_call_operand.hbm [shape: f32[2,1024], index: 0, kind: input, shape index: {}]   ;;  %s135_s1 = inlined_call_operand.hbm [shape: f32[2,1024], index: 1, kind: output, shape index: {}]  }
   0x1   :  { %7 = vsyncpa [#allocation4], 0  ;;  %s98_s6 = smov [#allocation2]   ;;  %s50_s10 = scalar_lea.hbm %s134_s0, 256 }
   0x2   :  { %s14_s7 = sshll.u32 %s98_s6, 4  ;;  %p51_p0 = scmp.ne.s32.totalorder %s134_s0, %s50_s10  ;;  %s15_s7 = int_to_ptr.vmem [resolvable:$true] %s14_s7 }
   0x3   :  { %p54_p1 = scmp.lt.u32.totalorder %s50_s10, %s134_s0 }
   0x5   :  { %p56_p2 = pnand %p54_p1, %p51_p0 }
   0x7   :  { %59 = shalt.err (!%p56_p2)
}
   0x8   :  { %s60_s15 = scalar_lea.vmem %s15_s7, 256  ;;  %p65_p4 = scmp.lt.s32.totalorder %s15_s7, %s15_s7 }
   0x9   :  { %p61_p3 = scmp.ne.s32.totalorder %s15_s7, %s60_s15  ;;  %p66_p5 = scmp.lt.s32.totalorder %s60_s15, %s60_s15 }
   0xb   :  { %p67_p6 = por %p66_p5, %p65_p4 }
   0xd   :  { %p68_p7 = pnand %p67_p6, %p61_p3 }
   0xf   :  { %71 = shalt.err (!%p68_p7)
}
  0x10   :  { %17 = dma.hbm_to_vmem [thread:$0]  %s134_s0, 256, %s15_s7, [#allocation3]  }
  0x11   :  { %94 = dma.done.wait [#allocation3], 256  }
  0x12   :  { %95 = vsyncadd [#allocation3], 4294967040  ;;  %v21_v0 = vld [vmem:[#allocation2] sm:$0xff]  ;;  %v22_v1 = vld [vmem:[#allocation2 + $0x8] sm:$0xff]  ;;  %s99_s18 = smov [#allocation5]  }
  0x13   :  { %46 = vtanh.f32 %v21_v0  ;;  %s35_s19 = sshll.u32 %s99_s18, 4  ;;  %s36_s19 = int_to_ptr.vmem [resolvable:$true] %s35_s19 }
  0x14   :  { %48 = vtanh.f32 %v22_v1  ;;  %s72_s20 = scalar_lea.vmem %s36_s19, 256  ;;  %p77_p9 = scmp.lt.s32.totalorder %s36_s19, %s36_s19 }
  0x15   :  { %p73_p8 = scmp.ne.s32.totalorder %s36_s19, %s72_s20  ;;  %p78_p10 = scmp.lt.s32.totalorder %s72_s20, %s72_s20 }
  0x17   :  { %p79_p11 = por %p78_p10, %p77_p9 }
  0x19   :  { %p80_p12 = pnand %p79_p11, %p73_p8 }
  0x1d   :  { %v47_v2 = vpop.eup %46 }
  0x1e   :  { %v49_v3 = vpop.eup %48  ;;  %v25_v4 = vand.u32 2147483647, %v47_v2 }
  0x1f   :  { %v26_v5 = vand.u32 2147483647, %v49_v3 }
  0x20   :  { %27 = vst [vmem:[#allocation5] sm:$0xff] %v25_v4 }
  0x21   :  { %28 = vst [vmem:[#allocation5 + $0x8] sm:$0xff] %v26_v5 }
  0x22   :  { %83 = shalt.err (!%p80_p12)
}
  0x23   :  { %s84_s22 = scalar_lea.hbm %s135_s1, 256 }
  0x24   :  { %p85_p13 = scmp.ne.s32.totalorder %s135_s1, %s84_s22  ;;  %p88_p0 = scmp.lt.u32.totalorder %s84_s22, %s135_s1 }
  0x26   :  { %p90_p1 = pnand %p88_p0, %p85_p13 }
  0x28   :  { %93 = shalt.err (!%p90_p1)
}
  0x29   :  { %38 = dma.vmem_to_hbm [thread:$0]  %s36_s19, 256, %s135_s1, [#allocation4]  }
  0x2a   :  { %96 = dma.done.wait [#allocation4], 256  }
  0x2b   :  { %97 = vsyncadd [#allocation4], 4294967040 }
  0x2c   :  { %42 = vsyncpa [#allocation3], 1 }
  0x2d   :  { %43 = vsyncpa [#allocation4], 1 }

</bundles_post_ra>
